<compile_context>
chip_gen: v7x
topology: tpu7x:2x2x1
jax: 0.10.0
libtpu: 0.0.40
codegen_flags: <defaults>
</compile_context>

<pallas_src>
import functools

import jax
import jax.numpy as jnp
from jax.experimental import pallas as pl
from jax.experimental.pallas import tpu as pltpu


_MIB = 1024 * 1024
_MAX_COLS = 16384                 # lane-dense column cap (multiple of 128)
_MIN_PALLAS_BYTES = 4 * _MIB      # below this, fused XLA clamp is used


def _clip_kernel(x_ref, o_ref, *, min_val, max_val):
    x = x_ref[...]
    if min_val is not None:
        x = jnp.maximum(x, jnp.asarray(min_val, dtype=x.dtype))
    if max_val is not None:
        x = jnp.minimum(x, jnp.asarray(max_val, dtype=x.dtype))
    o_ref[...] = x


def _jnp_clip(x, min_val, max_val):
    # torch.clamp semantics with optional bounds (None == unbounded side).
    # TODO(synk): integer tensors with Python-float bounds truncate the bound to
    # the tensor dtype here, which differs from torch.clamp's type promotion.
    if min_val is not None:
        x = jnp.maximum(x, jnp.asarray(min_val, dtype=x.dtype))
    if max_val is not None:
        x = jnp.minimum(x, jnp.asarray(max_val, dtype=x.dtype))
    return x


def _tpu_generation():
    try:
        kind = jax.devices()[0].device_kind.lower()
    except Exception:
        return None
    for gen in (7, 6, 5, 4):
        if f"v{gen}" in kind or f"tpu{gen}" in kind or f"tpu {gen}" in kind:
            return gen
    return None


def _chip_config():
    """Return (target_block_bytes, vmem_limit_bytes, min_grid_blocks, want_core_parallel)."""
    gen = _tpu_generation()
    if gen == 7:
        # 3.2 TB/s per-TC HBM: bigger blocks hide the ~0.35 us/step grid
        # overhead; 2 x (in+out) x 6 MiB = 24 MiB stays under the 32 MiB scoped
        # limit (64 MiB physical per TC) even with both TCs pipelining.
        return 6 * _MIB, 32 * _MIB, 4, True
    if gen == 6:
        # 128 MiB physical VMEM; raise the 32 MiB scoped default to 64 MiB so
        # 8 MiB blocks (32 MiB of double-buffers) fit comfortably.
        return 8 * _MIB, 64 * _MIB, 2, False
    # v5e / v4 / unknown: conservative blocks, explicit 32 MiB limit (v5e's
    # scoped default is only 16 MiB).
    return 4 * _MIB, 32 * _MIB, 2, False


def _pick_cols(total):
    # Largest multiple-of-128 divisor of `total`, capped at _MAX_COLS, so the
    # reshape is a free relayout (no pad / tail) and stores stay unmasked vst.
    units = total // 128
    for m in range(min(units, _MAX_COLS // 128), 0, -1):
        if units % m == 0:
            return 128 * m
    return 128


def _pick_block_rows(rows, row_bytes, sublane, target_bytes, min_blocks):
    if rows <= sublane:
        return rows  # single full-extent block (exempt from (8,128) divisibility)
    target_rows = max(sublane, (target_bytes // row_bytes) // sublane * sublane)
    # Keep at least `min_blocks` grid steps when the array allows it, so DMA and
    # compute overlap and (on v7x) both TensorCores get work.
    if rows >= min_blocks * sublane:
        cap = max(sublane, (rows // min_blocks) // sublane * sublane)
        target_rows = min(target_rows, cap)
    if rows % sublane == 0:
        # Largest multiple-of-sublane divisor of rows <= target_rows: the final
        # grid step is then a full block (no masked tail DMA / partial store).
        r_units = rows // sublane
        limit = max(1, target_rows // sublane)
        best = 1
        i = 1
        while i * i <= r_units:
            if r_units % i == 0:
                lo, hi = i, r_units // i
                if lo <= limit and lo > best:
                    best = lo
                if hi <= limit and hi > best:
                    best = hi
            i += 1
        if best * sublane * 4 >= target_rows:
            return best * sublane
        # All divisors are far below the target: prefer near-target blocks with
        # one short (masked) tail block over many tiny blocks.
        return target_rows
    # Ragged row count: accept a masked tail block.
    return min(target_rows, pl.cdiv(rows, sublane) * sublane)


def _clip_pallas(x2d, min_val, max_val, block_rows, grid_rows, semantics,
                 vmem_limit, bytes_accessed, alias_input):
    rows, cols = x2d.shape
    kwargs = {}
    if alias_input:
        kwargs["input_output_aliases"] = {0: 0}
    return pl.pallas_call(
        functools.partial(_clip_kernel, min_val=min_val, max_val=max_val),
        out_shape=jax.ShapeDtypeStruct((rows, cols), x2d.dtype),
        grid_spec=pltpu.PrefetchScalarGridSpec(
            num_scalar_prefetch=0,
            grid=(grid_rows,),
            in_specs=[pl.BlockSpec((block_rows, cols), lambda i: (i, 0))],
            out_specs=pl.BlockSpec((block_rows, cols), lambda i: (i, 0)),
        ),
        compiler_params=pltpu.CompilerParams(
            dimension_semantics=(semantics,),
            vmem_limit_bytes=vmem_limit,
        ),
        cost_estimate=pl.CostEstimate(
            flops=0,
            transcendentals=0,
            bytes_accessed=bytes_accessed,
        ),
        **kwargs,
    )(x2d)


def onnx_clip(x, min_val=None, max_val=None, *, force_pallas=False,
              donate_input=False):
    """Elementwise clamp(x, min_val, max_val), matching torch.clamp semantics
    (None bound == unbounded on that side).

    Note: force_pallas is ignored (fused XLA clamp is used) when the flat
    element count is not a multiple of 128, since padding would add extra HBM
    passes to an otherwise 1-read/1-write kernel.
    """
    if min_val is None and max_val is None:
        return x

    orig_shape = x.shape
    dtype = x.dtype
    itemsize = jnp.dtype(dtype).itemsize

    total = 1
    for d in orig_shape:
        total *= d

    ragged = total == 0 or (total % 128) != 0
    small = total * itemsize < _MIN_PALLAS_BYTES
    if ragged or (small and not force_pallas):
        return _jnp_clip(x, min_val, max_val)

    target_block_bytes, vmem_limit, min_blocks, want_core_parallel = _chip_config()

    cols = _pick_cols(total)
    rows = total // cols
    # Dtype-aware sublane packing: 8 rows (4-byte), 16 (2-byte), 32 (1-byte).
    sublane = max(8, 8 * (4 // itemsize))
    block_rows = _pick_block_rows(rows, cols * itemsize, sublane,
                                  target_block_bytes, min_blocks)
    grid_rows = pl.cdiv(rows, block_rows)

    x2d = x.reshape(rows, cols)
    bytes_accessed = 2 * total * itemsize

    semantics = "parallel"
    if want_core_parallel and grid_rows >= 2:
        semantics = getattr(pltpu, "CORE_PARALLEL", "parallel")

    try:
        out2d = _clip_pallas(x2d, min_val, max_val, block_rows, grid_rows,
                             semantics, vmem_limit, bytes_accessed, donate_input)
    except Exception:
        if semantics == "parallel":
            raise
        # CORE_PARALLEL unsupported in this configuration -> retry with the
        # portable semantics rather than failing.
        out2d = _clip_pallas(x2d, min_val, max_val, block_rows, grid_rows,
                             "parallel", vmem_limit, bytes_accessed, donate_input)

    return out2d.reshape(orig_shape)


if __name__ == "__main__":
    key = jax.random.PRNGKey(0)
    # Small NCHW input consistent with typical ONNX Clip usage.
    x = jax.random.normal(key, (2, 4, 16, 16), dtype=jnp.float32) * 3.0

    min_val, max_val = -1.0, 1.0
    # force_pallas so the small demo shape exercises the Pallas path.
    out = onnx_clip(x, min_val, max_val, force_pallas=True)
    out = jax.block_until_ready(out)

    ref = jnp.clip(x, min_val, max_val)
    assert out.shape == x.shape and out.dtype == x.dtype
    assert jnp.allclose(out, ref), "mismatch vs reference clamp"

    # Optional-bound paths (min only / max only / neither).
    o_min = jax.block_until_ready(onnx_clip(x, 0.0, None, force_pallas=True))
    assert jnp.allclose(o_min, jnp.maximum(x, 0.0))
    o_max = jax.block_until_ready(onnx_clip(x, None, 0.5, force_pallas=True))
    assert jnp.allclose(o_max, jnp.minimum(x, 0.5))
    o_none = jax.block_until_ready(onnx_clip(x, None, None, force_pallas=True))
    assert jnp.allclose(o_none, x)

    # bf16 path (exercises dtype-aware sublane packing).
    xb = x.astype(jnp.bfloat16)
    ob = jax.block_until_ready(onnx_clip(xb, -1.0, 1.0, force_pallas=True))
    assert ob.dtype == jnp.bfloat16
    assert jnp.allclose(
        ob.astype(jnp.float32),
        jnp.clip(xb, -1.0, 1.0).astype(jnp.float32),
    )

    # Larger input: multi-block pipeline with generation-sized blocks.
    xl = jax.random.normal(jax.random.PRNGKey(1), (8, 64, 64, 64), jnp.float32)
    ol = jax.block_until_ready(onnx_clip(xl, -0.3, 0.7))
    assert jnp.allclose(ol, jnp.clip(xl, -0.3, 0.7))

    # Aliased (in-place style) variant: output may reuse the input HBM buffer.
    xd = jax.random.normal(jax.random.PRNGKey(2), (4, 64, 64, 64), jnp.float32)
    ref_d = jax.block_until_ready(jnp.clip(xd, -0.5, 0.5))
    od = jax.block_until_ready(onnx_clip(xd, -0.5, 0.5, donate_input=True))
    assert jnp.allclose(od, ref_d)

    print("KERNEL_OK")
</pallas_src>

<mosaic_0001>
module attributes {stable_mosaic.version = 11 : i64} {
  func.func @_clip_kernel(%arg0: i32, %arg1: memref<1x2048xf32, #tpu.memory_space<vmem>>, %arg2: memref<1x2048xf32, #tpu.memory_space<vmem>>) attributes {dimension_semantics = [#tpu.dimension_semantics<parallel>], iteration_bounds = array<i64: 1>, scalar_prefetch = 0 : i64, scratch_operands = 0 : i64, tpu.core_type = #tpu.core_type<tc>, window_params = [{transform_indices = @transform_0, window_bounds = array<i64: 1, 2048>}, {transform_indices = @transform_1, window_bounds = array<i64: 1, 2048>}]} {
    %c0 = arith.constant 0 : index
    %c0_0 = arith.constant 0 : index
    %0 = vector.load %arg1[%c0, %c0_0] : memref<1x2048xf32, #tpu.memory_space<vmem>>, vector<1x2048xf32>
    %cst = arith.constant -1.000000e+00 : f32
    %1 = vector.broadcast %cst : f32 to vector<1x2048xf32>
    %2 = arith.maximumf %0, %1 : vector<1x2048xf32>
    %cst_1 = arith.constant 1.000000e+00 : f32
    %3 = vector.broadcast %cst_1 : f32 to vector<1x2048xf32>
    %4 = arith.minimumf %2, %3 : vector<1x2048xf32>
    %c0_2 = arith.constant 0 : index
    %c0_3 = arith.constant 0 : index
    %5 = vector.load %arg2[%c0_2, %c0_3] : memref<1x2048xf32, #tpu.memory_space<vmem>>, vector<1x2048xf32>
    tpu.vector_store %arg2[%c0_2, %c0_3], %4 {strides = array<i32>} : memref<1x2048xf32, #tpu.memory_space<vmem>>, vector<1x2048xf32>,
    return
  }
  func.func @transform_0(%arg0: i32) -> (i32, i32) {
    %c0_i32 = arith.constant 0 : i32
    %c0_i32_0 = arith.constant 0 : i32
    return %arg0, %c0_i32 : i32, i32
  }
  func.func @transform_1(%arg0: i32) -> (i32, i32) {
    %c0_i32 = arith.constant 0 : i32
    %c0_i32_0 = arith.constant 0 : i32
    return %arg0, %c0_i32 : i32, i32
  }
}

</mosaic_0001>

<bundles_post_ra>
// kernel: tpu_custom_call.1
= control target key start
LH: loop header
LB: loop body
LE: loop exit
PB: predicated region body
PF: predicated region fallthrough
CT: control target
= control target key end

     0   :  { %6 = vsyncpa [#allocation3], 0  ;;  %s132_s0 = inlined_call_operand.hbm [shape: f32[1,2048], index: 0, kind: input, shape index: {}]   ;;  %s133_s1 = inlined_call_operand.hbm [shape: f32[1,2048], index: 1, kind: output, shape index: {}]  }
   0x1   :  { %7 = vsyncpa [#allocation4], 0  ;;  %s96_s6 = smov [#allocation2]   ;;  %s48_s10 = scalar_lea.hbm %s132_s0, 256 }
   0x2   :  { %s14_s7 = sshll.u32 %s96_s6, 4  ;;  %p49_p0 = scmp.ne.s32.totalorder %s132_s0, %s48_s10  ;;  %s15_s7 = int_to_ptr.vmem [resolvable:$true] %s14_s7 }
   0x3   :  { %p52_p1 = scmp.lt.u32.totalorder %s48_s10, %s132_s0 }
   0x5   :  { %p54_p2 = pnand %p52_p1, %p49_p0 }
   0x7   :  { %57 = shalt.err (!%p54_p2)
}
   0x8   :  { %s58_s15 = scalar_lea.vmem %s15_s7, 256  ;;  %p63_p4 = scmp.lt.s32.totalorder %s15_s7, %s15_s7 }
   0x9   :  { %p59_p3 = scmp.ne.s32.totalorder %s15_s7, %s58_s15  ;;  %p64_p5 = scmp.lt.s32.totalorder %s58_s15, %s58_s15 }
   0xb   :  { %p65_p6 = por %p64_p5, %p63_p4 }
   0xd   :  { %p66_p7 = pnand %p65_p6, %p59_p3 }
   0xf   :  { %69 = shalt.err (!%p66_p7)
}
  0x10   :  { %17 = dma.hbm_to_vmem [thread:$0]  %s132_s0, 256, %s15_s7, [#allocation3]  }
  0x11   :  { %92 = dma.done.wait [#allocation3], 256  }
  0x12   :  { %93 = vsyncadd [#allocation3], 4294967040  ;;  %s97_s18 = smov [#allocation5]   ;;  %v21_v0 = vld [vmem:[#allocation2] sm:$0xff]  ;;  %v22_v1 = vld [vmem:[#allocation2 + $0x8] sm:$0xff] }
  0x13   :  { %s35_s19 = sshll.u32 %s97_s18, 4  ;;  %v44_v2 = vclamps-f32 %v21_v0, 1.0  ;;  %v45_v3 = vclamps-f32 %v22_v1, 1.0  ;;  %s36_s19 = int_to_ptr.vmem [resolvable:$true] %s35_s19 }
  0x14   :  { %s70_s20 = scalar_lea.vmem %s36_s19, 256  ;;  %p75_p9 = scmp.lt.s32.totalorder %s36_s19, %s36_s19 }
  0x15   :  { %27 = vst [vmem:[#allocation5] sm:$0xff] %v44_v2  ;;  %28 = vst [vmem:[#allocation5 + $0x8] sm:$0xff] %v45_v3  ;;  %p71_p8 = scmp.ne.s32.totalorder %s36_s19, %s70_s20  ;;  %p76_p10 = scmp.lt.s32.totalorder %s70_s20, %s70_s20 }
  0x17   :  { %p77_p11 = por %p76_p10, %p75_p9 }
  0x19   :  { %p78_p12 = pnand %p77_p11, %p71_p8 }
  0x1b   :  { %81 = shalt.err (!%p78_p12)
}
  0x1c   :  { %s82_s22 = scalar_lea.hbm %s133_s1, 256 }
  0x1d   :  { %p83_p13 = scmp.ne.s32.totalorder %s133_s1, %s82_s22  ;;  %p86_p0 = scmp.lt.u32.totalorder %s82_s22, %s133_s1 }
  0x1f   :  { %p88_p1 = pnand %p86_p0, %p83_p13 }
  0x21   :  { %91 = shalt.err (!%p88_p1)
}
  0x22   :  { %38 = dma.vmem_to_hbm [thread:$0]  %s36_s19, 256, %s133_s1, [#allocation4]  }
  0x23   :  { %94 = dma.done.wait [#allocation4], 256  }
  0x24   :  { %95 = vsyncadd [#allocation4], 4294967040 }
  0x25   :  { %42 = vsyncpa [#allocation3], 1 }
  0x26   :  { %43 = vsyncpa [#allocation4], 1 }

</bundles_post_ra>
